<compile_context>
chip_gen: v7x
topology: tpu7x:2x2x1
jax: 0.10.0
libtpu: 0.0.40
codegen_flags: <defaults>
</compile_context>

<pallas_src>
import functools

import jax
import jax.numpy as jnp
import numpy as np
from jax.experimental import pallas as pl
from jax.experimental.pallas import tpu as pltpu


def _round_up(x: int, m: int) -> int:
    return ((x + m - 1) // m) * m


def _decoder_kernel(row_ref, col_ref, emb_t_ref, out_ref, *, n_pad: int):
    """Decode one tile of edges.

    row_ref  : VMEM (1, edge_tile) int32  -- source node ids for this tile
    col_ref  : VMEM (1, edge_tile) int32  -- target node ids for this tile
    emb_t_ref: VMEM (D_pad, N_pad) f32    -- transposed embedding table (resident)
    out_ref  : VMEM (1, edge_tile) f32    -- lane-dense edge probabilities
    """
    rows = row_ref[...]                         # (1, TE) int32
    cols = col_ref[...]                         # (1, TE) int32
    edge_tile = rows.shape[1]

    # One-hot gather on the MXU: onehot[n, e] = (idx[e] == n).
    node_iota = jax.lax.broadcasted_iota(jnp.int32, (n_pad, edge_tile), 0)
    onehot_src = (node_iota == rows).astype(jnp.float32)    # (N_pad, TE)
    onehot_tgt = (node_iota == cols).astype(jnp.float32)    # (N_pad, TE)

    emb_t = emb_t_ref[...]                                   # (D_pad, N_pad)
    src_t = jnp.dot(emb_t, onehot_src,
                    preferred_element_type=jnp.float32)      # (D_pad, TE)
    tgt_t = jnp.dot(emb_t, onehot_tgt,
                    preferred_element_type=jnp.float32)      # (D_pad, TE)

    # Dot-product over features = cross-sublane reduce -> already lane-dense.
    logits = jnp.sum(src_t * tgt_t, axis=0, keepdims=True)   # (1, TE)
    out_ref[...] = jax.nn.sigmoid(logits)


def inner_product_decoder(embeddings: jax.Array, edge_index: jax.Array,
                          *, edge_tile: int = 512) -> jax.Array:
    """embeddings: [N, D] float, edge_index: [2, E] int -> [E] float32 probs."""
    embeddings = embeddings.astype(jnp.float32)
    edge_index = edge_index.astype(jnp.int32)

    n_nodes, d = embeddings.shape
    n_edges = edge_index.shape[1]

    n_pad = _round_up(max(n_nodes, 1), 128)       # lane-aligned node axis
    d_pad = _round_up(max(d, 1), 128)             # lane/sublane-aligned features
    e_pad = _round_up(max(n_edges, 1), edge_tile)
    n_tiles = e_pad // edge_tile

    # Transposed, zero-padded embedding table (padding contributes exact 0s).
    emb_t = jnp.zeros((d_pad, n_pad), jnp.float32).at[:d, :n_nodes].set(embeddings.T)

    # Tiled VMEM index inputs; padded edge slots point at node 0 and are trimmed.
    rows = jnp.zeros((e_pad,), jnp.int32).at[:n_edges].set(edge_index[0])
    cols = jnp.zeros((e_pad,), jnp.int32).at[:n_edges].set(edge_index[1])
    rows = rows.reshape(n_tiles, edge_tile)
    cols = cols.reshape(n_tiles, edge_tile)

    # Generation-aware VMEM budget.
    try:
        vmem_cap = int(pltpu.get_tpu_info().vmem_capacity_bytes)
    except Exception:                              # pragma: no cover
        vmem_cap = 64 * 1024 * 1024                # v7x per-TC floor (conservative)

    table_bytes = d_pad * n_pad * 4
    idx_bytes = 2 * 2 * edge_tile * 4              # rows+cols blocks, double-buffered
    out_bytes = 2 * edge_tile * 4                  # output block, double-buffered
    temp_bytes = 4 * (n_pad + d_pad) * edge_tile * 4   # one-hots + gathered tiles headroom
    needed = 2 * table_bytes + idx_bytes + out_bytes + temp_bytes + (2 << 20)
    if needed > int(0.9 * vmem_cap):
        # TODO(synk): fall back to the DMA-gather / N-tiled path instead of raising.
        raise NotImplementedError(
            "embedding table too large for the resident-VMEM one-hot gather path")
    vmem_limit = int(min(max(needed, 32 * 1024 * 1024), int(0.9 * vmem_cap)))

    cost = pl.CostEstimate(
        flops=4 * d_pad * n_pad * e_pad + 2 * d_pad * e_pad,   # 2 gathers + mul/reduce
        transcendentals=e_pad,                                  # sigmoid
        bytes_accessed=table_bytes + 2 * e_pad * 4 + e_pad * 4,
    )

    kernel = functools.partial(_decoder_kernel, n_pad=n_pad)

    out = pl.pallas_call(
        kernel,
        out_shape=jax.ShapeDtypeStruct((n_tiles, edge_tile), jnp.float32),
        grid_spec=pltpu.PrefetchScalarGridSpec(
            num_scalar_prefetch=0,
            grid=(n_tiles,),
            in_specs=[
                pl.BlockSpec((1, edge_tile), lambda i: (i, 0)),     # rows
                pl.BlockSpec((1, edge_tile), lambda i: (i, 0)),     # cols
                pl.BlockSpec((d_pad, n_pad), lambda i: (0, 0)),     # emb^T, resident
            ],
            out_specs=pl.BlockSpec((1, edge_tile), lambda i: (i, 0)),
        ),
        compiler_params=pltpu.CompilerParams(
            dimension_semantics=(pltpu.PARALLEL,),
            vmem_limit_bytes=vmem_limit,
        ),
        cost_estimate=cost,
    )(rows, cols, emb_t)

    return out.reshape(-1)[:n_edges]


if __name__ == "__main__":
    key = jax.random.PRNGKey(0)
    k_emb, k_row, k_col = jax.random.split(key, 3)

    num_nodes, hidden, num_edges = 8, 32, 16
    embeddings = jax.random.normal(k_emb, (num_nodes, hidden), dtype=jnp.float32)
    row = jax.random.randint(k_row, (num_edges,), 0, num_nodes, dtype=jnp.int32)
    col = jax.random.randint(k_col, (num_edges,), 0, num_nodes, dtype=jnp.int32)
    edge_index = jnp.stack([row, col], axis=0)        # (2, E)

    edge_probs = jax.block_until_ready(inner_product_decoder(embeddings, edge_index))

    # Pure-JAX reference (dropout is identity in eval mode).
    ref = jax.nn.sigmoid(jnp.sum(embeddings[row] * embeddings[col], axis=1))
    assert edge_probs.shape == (num_edges,)
    assert np.allclose(np.asarray(edge_probs), np.asarray(ref), atol=1e-5, rtol=1e-5)

    print("KERNEL_OK")
</pallas_src>

<mosaic_0001>
module attributes {stable_mosaic.version = 11 : i64} {
  func.func @_decoder_kernel(%arg0: i32, %arg1: memref<1x512xi32, #tpu.memory_space<vmem>>, %arg2: memref<1x512xi32, #tpu.memory_space<vmem>>, %arg3: memref<128x128xf32, #tpu.memory_space<vmem>>, %arg4: memref<1x512xf32, #tpu.memory_space<vmem>>) attributes {dimension_semantics = [#tpu.dimension_semantics<parallel>], iteration_bounds = array<i64: 1>, scalar_prefetch = 0 : i64, scratch_operands = 0 : i64, tpu.core_type = #tpu.core_type<tc>, window_params = [{transform_indices = @transform_0, window_bounds = array<i64: 1, 512>}, {transform_indices = @transform_1, window_bounds = array<i64: 1, 512>}, {pipeline_mode = #tpu.pipeline_mode<synchronous>, transform_indices = @transform_2, window_bounds = array<i64: 128, 128>}, {transform_indices = @transform_3, window_bounds = array<i64: 1, 512>}]} {
    %c0 = arith.constant 0 : index
    %c0_0 = arith.constant 0 : index
    %0 = vector.load %arg1[%c0, %c0_0] : memref<1x512xi32, #tpu.memory_space<vmem>>, vector<1x512xi32>
    %c0_1 = arith.constant 0 : index
    %c0_2 = arith.constant 0 : index
    %1 = vector.load %arg2[%c0_1, %c0_2] : memref<1x512xi32, #tpu.memory_space<vmem>>, vector<1x512xi32>
    %2 = tpu.iota {dimensions = array<i32: 0>} : vector<128x512xi32>
    %3 = vector.broadcast %0 : vector<1x512xi32> to vector<128x512xi32>
    %4 = arith.cmpi eq, %2, %3 : vector<128x512xi32>
    %5 = arith.extui %4 : vector<128x512xi1> to vector<128x512xi32>
    %6 = arith.sitofp %5 : vector<128x512xi32> to vector<128x512xf32>
    %7 = vector.broadcast %1 : vector<1x512xi32> to vector<128x512xi32>
    %8 = arith.cmpi eq, %2, %7 : vector<128x512xi32>
    %9 = arith.extui %8 : vector<128x512xi1> to vector<128x512xi32>
    %10 = arith.sitofp %9 : vector<128x512xi32> to vector<128x512xf32>
    %c0_3 = arith.constant 0 : index
    %c0_4 = arith.constant 0 : index
    %11 = vector.load %arg3[%c0_3, %c0_4] : memref<128x128xf32, #tpu.memory_space<vmem>>, vector<128x128xf32>
    %cst = arith.constant dense<0.000000e+00> : vector<128x512xf32>
    %12 = tpu.matmul %11, %6, %cst {dimension_numbers = #tpu.dot_dimension_numbers<[1], [0], [0], [1], [0, 0, 1, 1], [], []>} : vector<128x128xf32>, vector<128x512xf32>, vector<128x512xf32> -> vector<128x512xf32>
    %cst_5 = arith.constant dense<0.000000e+00> : vector<128x512xf32>
    %13 = tpu.matmul %11, %10, %cst_5 {dimension_numbers = #tpu.dot_dimension_numbers<[1], [0], [0], [1], [0, 0, 1, 1], [], []>} : vector<128x128xf32>, vector<128x512xf32>, vector<128x512xf32> -> vector<128x512xf32>
    %14 = arith.mulf %12, %13 : vector<128x512xf32>
    %cst_6 = arith.constant dense<0.000000e+00> : vector<512xf32>
    %15 = vector.multi_reduction <add>, %14, %cst_6 [0] : vector<128x512xf32> to vector<512xf32>
    %16 = vector.shape_cast %15 : vector<512xf32> to vector<1x512xf32>
    %17 = arith.negf %16 : vector<1x512xf32>
    %18 = math.exp %17 : vector<1x512xf32>
    %cst_7 = arith.constant 1.000000e+00 : f32
    %19 = vector.broadcast %cst_7 : f32 to vector<1x512xf32>
    %20 = arith.addf %19, %18 : vector<1x512xf32>
    %21 = arith.divf %19, %20 : vector<1x512xf32>
    %c0_8 = arith.constant 0 : index
    %c0_9 = arith.constant 0 : index
    %22 = vector.load %arg4[%c0_8, %c0_9] : memref<1x512xf32, #tpu.memory_space<vmem>>, vector<1x512xf32>
    tpu.vector_store %arg4[%c0_8, %c0_9], %21 {strides = array<i32>} : memref<1x512xf32, #tpu.memory_space<vmem>>, vector<1x512xf32>,
    return
  }
  func.func @transform_0(%arg0: i32) -> (i32, i32) {
    %c0_i32 = arith.constant 0 : i32
    %c0_i32_0 = arith.constant 0 : i32
    return %arg0, %c0_i32 : i32, i32
  }
  func.func @transform_1(%arg0: i32) -> (i32, i32) {
    %c0_i32 = arith.constant 0 : i32
    %c0_i32_0 = arith.constant 0 : i32
    return %arg0, %c0_i32 : i32, i32
  }
  func.func @transform_2(%arg0: i32) -> (i32, i32) {
    %c0_i32 = arith.constant 0 : i32
    %c0_i32_0 = arith.constant 0 : i32
    %c0_i32_1 = arith.constant 0 : i32
    return %c0_i32, %c0_i32_0 : i32, i32
  }
  func.func @transform_3(%arg0: i32) -> (i32, i32) {
    %c0_i32 = arith.constant 0 : i32
    %c0_i32_0 = arith.constant 0 : i32
    return %arg0, %c0_i32 : i32, i32
  }
}

</mosaic_0001>

<bundles_post_ra>
// kernel: tpu_custom_call.1
= control target key start
LH: loop header
LB: loop body
LE: loop exit
PB: predicated region body
PF: predicated region fallthrough
CT: control target
= control target key end

     0   :  { %8 = vsyncpa [#allocation3], 0  ;;  %s2771_s0 = inlined_call_operand.hbm [shape: s32[1,512], index: 0, kind: input, shape index: {}]   ;;  %s2772_s1 = inlined_call_operand.hbm [shape: s32[1,512], index: 1, kind: input, shape index: {}]   ;;  %s2773_s2 = inlined_call_operand.hbm [shape: f32[128,128], index: 2, kind: input, shape index: {}]   ;;  %s2774_s3 = inlined_call_operand.hbm [shape: f32[1,512], index: 3, kind: output, shape index: {}]  }
   0x1   :  { %9 = vsyncpa [#allocation6], 0 }
   0x2   :  { %10 = vsyncpa [#allocation4], 0  ;;  %s1876_s12 = smov [#allocation5]   ;;  %s1877_s14 = smov [#allocation2]  }
   0x3   :  { %s27_s13 = sshll.u32 %s1876_s12, 4  ;;  %s17_s15 = sshll.u32 %s1877_s14, 4  ;;  %s28_s13 = int_to_ptr.vmem [resolvable:$true] %s27_s13  ;;  %s18_s15 = int_to_ptr.vmem [resolvable:$true] %s17_s15 }
   0x4   :  { %s1782_s18 = scalar_lea.hbm %s2772_s1, 64 }
   0x5   :  { %p1783_p0 = scmp.ne.s32.totalorder %s2772_s1, %s1782_s18  ;;  %p1786_p1 = scmp.lt.u32.totalorder %s1782_s18, %s2772_s1 }
   0x7   :  { %p1788_p2 = pnand %p1786_p1, %p1783_p0 }
   0x9   :  { %1791 = shalt.err (!%p1788_p2)
}
   0xa   :  { %s1792_s23 = scalar_lea.vmem %s28_s13, 64  ;;  %p1797_p4 = scmp.lt.s32.totalorder %s28_s13, %s28_s13 }
   0xb   :  { %p1793_p3 = scmp.ne.s32.totalorder %s28_s13, %s1792_s23  ;;  %p1798_p5 = scmp.lt.s32.totalorder %s1792_s23, %s1792_s23 }
   0xd   :  { %p1799_p6 = por %p1798_p5, %p1797_p4 }
   0xf   :  { %p1800_p7 = pnand %p1799_p6, %p1793_p3 }
  0x11   :  { %1803 = shalt.err (!%p1800_p7)
}
  0x12   :  { %30 = dma.hbm_to_vmem [thread:$0]  %s2772_s1, 64, %s28_s13, [#allocation6]  }
  0x13   :  { %s1804_s28 = scalar_lea.hbm %s2771_s0, 64 }
  0x14   :  { %p1805_p8 = scmp.ne.s32.totalorder %s2771_s0, %s1804_s28  ;;  %p1808_p9 = scmp.lt.u32.totalorder %s1804_s28, %s2771_s0 }
  0x16   :  { %p1810_p10 = pnand %p1808_p9, %p1805_p8 }
  0x18   :  { %1813 = shalt.err (!%p1810_p10)
}
  0x19   :  { %s1814_s6 = scalar_lea.vmem %s18_s15, 64  ;;  %p1819_p12 = scmp.lt.s32.totalorder %s18_s15, %s18_s15 }
  0x1a   :  { %p1815_p11 = scmp.ne.s32.totalorder %s18_s15, %s1814_s6  ;;  %p1820_p13 = scmp.lt.s32.totalorder %s1814_s6, %s1814_s6 }
  0x1c   :  { %p1821_p0 = por %p1820_p13, %p1819_p12 }
  0x1e   :  { %p1822_p1 = pnand %p1821_p0, %p1815_p11 }
  0x20   :  { %1825 = shalt.err (!%p1822_p1)
}
  0x21   :  { %20 = dma.hbm_to_vmem [thread:$0]  %s2771_s0, 64, %s18_s15, [#allocation3]  }
  0x22   :  { %s1878_s8 = smov [#allocation7]   ;;  %s1826_s12 = scalar_lea.hbm %s2773_s2, 2048 }
  0x23   :  { %s36_s9 = sshll.u32 %s1878_s8, 4  ;;  %p1827_p2 = scmp.ne.s32.totalorder %s2773_s2, %s1826_s12  ;;  %s37_s9 = int_to_ptr.vmem [resolvable:$true] %s36_s9 }
  0x24   :  { %p1830_p3 = scmp.lt.u32.totalorder %s1826_s12, %s2773_s2 }
  0x26   :  { %p1832_p4 = pnand %p1830_p3, %p1827_p2 }
  0x28   :  { %1835 = shalt.err (!%p1832_p4)
}
  0x29   :  { %s1836_s18 = scalar_lea.vmem %s37_s9, 2048  ;;  %p1841_p6 = scmp.lt.s32.totalorder %s37_s9, %s37_s9 }
  0x2a   :  { %p1837_p5 = scmp.ne.s32.totalorder %s37_s9, %s1836_s18  ;;  %p1842_p7 = scmp.lt.s32.totalorder %s1836_s18, %s1836_s18 }
  0x2c   :  { %p1843_p8 = por %p1842_p7, %p1841_p6 }
  0x2e   :  { %p1844_p9 = pnand %p1843_p8, %p1837_p5 }
  0x30   :  { %1847 = shalt.err (!%p1844_p9)
}
  0x31   :  { %s1879_s0 = smov 128   ;;  %s1880_s15 = smov 8  }
  0x32   :  { %42 = dma.hbm_to_vmem [thread:$0]  %s2773_s2, 2048, %s37_s9, [#allocation6], %s1879_s0, %s1879_s0, %s1880_s15  }
  0x33   :  { %1870 = dma.done.wait [#allocation3], 64  }
  0x34   :  { %1871 = vsyncadd [#allocation3], 4294967232 }
  0x35   :  { %1872 = dma.done.wait [#allocation6], 2112  }
  0x36   :  { %1873 = vsyncadd [#allocation6], 4294965184  ;;  %v2775_v0 = vlaneseq  ;;  %v1881_v1 = vmov 0.0   ;;  %v52_v8 = vld [vmem:[#allocation2] sm:$0xf]  ;;  %v2194_v33 = vld [vmem:[#allocation7] sm:$0xff] }
  0x37   :  { %567 = vmatprep.mubr.f32.mxu0 %v1881_v1  ;;  %728 = vmatprep.mubr.f32.mxu1 %v1881_v1  ;;  %v1882_v15 = vmov 1.0|1.0   ;;  %v53_v28 = vld [vmem:[#allocation5] sm:$0xf]  ;;  %v2218_v34 = vld [vmem:[#allocation7 + $0x8] sm:$0xff]  ;;  %v2250_v35 = vld [vmem:[#allocation7 + $0x10] sm:$0xff] }
  0x38   :  { %v1944_v2 = vshrl.u32 %v2775_v0, 7  ;;  %v2285_v36 = vld [vmem:[#allocation7 + $0x18] sm:$0xff]  ;;  %v2320_v37 = vld [vmem:[#allocation7 + $0x20] sm:$0xff]  ;;  %v2355_v38 = vld [vmem:[#allocation7 + $0x28] sm:$0xff]  ;;  %s1884_s2 = smov [#allocation8]  }
  0x39   :  { %v2390_v39 = vld [vmem:[#allocation7 + $0x30] sm:$0xff]  ;;  %v2425_v40 = vld [vmem:[#allocation7 + $0x38] sm:$0xff]  ;;  %v2452_v41 = vld [vmem:[#allocation7 + $0x40] sm:$0xff]  ;;  %s1359_s21 = sshll.u32 %s1884_s2, 4  ;;  %s1360_s21 = int_to_ptr.vmem [resolvable:$true] %s1359_s21 }
  0x3a   :  { %2777 = vst [vmem:[#allocation12_spill] sm:$0xff] %v1944_v2  ;;  %v77_v3 = vsub.s32 1, %v1944_v2  ;;  %v85_v4 = vsub.s32 3, %v1944_v2  ;;  %v73_v5 = vsub.s32 0, %v1944_v2  ;;  %v81_v6 = vsub.s32 2, %v1944_v2  ;;  %v2460_v42 = vld [vmem:[#allocation7 + $0x48] sm:$0xff]  ;;  %p1853_p11 = scmp.lt.s32.totalorder %s1360_s21, %s1360_s21 }
  0x3b   :  { %v1951_v7 = vadd.s32 8, %v1944_v2  ;;  %v1954_v9 = vadd.s32 16, %v1944_v2  ;;  %v1957_v10 = vadd.s32 24, %v1944_v2  ;;  %v1997_v16 = vadd.s32 32, %v1944_v2  ;;  %v2466_v43 = vld [vmem:[#allocation7 + $0x50] sm:$0xff]  ;;  %v2472_v44 = vld [vmem:[#allocation7 + $0x58] sm:$0xff] }
  0x3c   :  { %v1961_v11 = vrot.slane %v52_v8, %v77_v3  ;;  %v1965_v12 = vrot.slane %v52_v8, %v85_v4  ;;  %v1969_v13 = vrot.slane %v52_v8, %v73_v5  ;;  %v1973_v14 = vrot.slane %v52_v8, %v81_v6  ;;  %v2478_v45 = vld [vmem:[#allocation7 + $0x60] sm:$0xff]  ;;  %v2484_v46 = vld [vmem:[#allocation7 + $0x68] sm:$0xff]  ;;  %v2490_v47 = vld [vmem:[#allocation7 + $0x70] sm:$0xff]  ;;  %s1848_s22 = scalar_lea.vmem %s1360_s21, 64 }
  0x3d   :  { %v2000_v17 = vadd.s32 40, %v1944_v2  ;;  %v2023_v18 = vadd.s32 48, %v1944_v2  ;;  %v2026_v19 = vadd.s32 56, %v1944_v2  ;;  %v2049_v20 = vadd.s32 64, %v1944_v2  ;;  %v2496_v48 = vld [vmem:[#allocation7 + $0x78] sm:$0xff]  ;;  %p1849_p10 = scmp.ne.s32.totalorder %s1360_s21, %s1848_s22  ;;  %p1854_p12 = scmp.lt.s32.totalorder %s1848_s22, %s1848_s22 }
  0x3e   :  { %vm88_vm0 = vcmp.eq.s32.totalorder %v1944_v2, %v1961_v11  ;;  %vm92_vm1 = vcmp.eq.s32.totalorder %v1951_v7, %v1961_v11  ;;  %vm90_vm2 = vcmp.eq.s32.totalorder %v1944_v2, %v1965_v12  ;;  %vm94_vm3 = vcmp.eq.s32.totalorder %v1951_v7, %v1965_v12 }
  0x3f   :  { %vm1629_vm4 = vmpackc.low %vm92_vm1, %vm88_vm0  ;;  %vm87_vm5 = vcmp.eq.s32.totalorder %v1944_v2, %v1969_v13  ;;  %vm91_vm6 = vcmp.eq.s32.totalorder %v1951_v7, %v1969_v13  ;;  %vm89_vm7 = vcmp.eq.s32.totalorder %v1944_v2, %v1973_v14  ;;  %vm93_vm8 = vcmp.eq.s32.totalorder %v1951_v7, %v1973_v14  ;;  %p1855_p13 = por %p1854_p12, %p1853_p11 }
  0x40   :  { %1630 = vmatprep.subr.msk.bf16.mxu0 %vm1629_vm4, %v1882_v15  ;;  %vm1661_vm9 = vmpackc.low %vm94_vm3, %vm90_vm2  ;;  %vm96_vm10 = vcmp.eq.s32.totalorder %v1954_v9, %v1961_v11  ;;  %vm100_vm11 = vcmp.eq.s32.totalorder %v1957_v10, %v1961_v11  ;;  %vm98_vm13 = vcmp.eq.s32.totalorder %v1954_v9, %v1965_v12  ;;  %vm102_vm14 = vcmp.eq.s32.totalorder %v1957_v10, %v1965_v12 }
  0x41   :  { %1662 = vmatprep.subr.msk.bf16.mxu1 %vm1661_vm9, %v1882_v15  ;;  %vm1631_vm12 = vmpackc.low %vm91_vm6, %vm87_vm5  ;;  %vm95_vm0 = vcmp.eq.s32.totalorder %v1954_v9, %v1969_v13  ;;  %vm99_vm1 = vcmp.eq.s32.totalorder %v1957_v10, %v1969_v13  ;;  %vm97_vm3 = vcmp.eq.s32.totalorder %v1954_v9, %v1973_v14  ;;  %vm101_vm4 = vcmp.eq.s32.totalorder %v1957_v10, %v1973_v14  ;;  %p1856_p0 = pnand %p1855_p13, %p1849_p10 }
  0x42   :  { %1632 = vmatpush1.bf16.msk.msra.mxu0 %vm1631_vm12, %v1882_v15  ;;  %vm1663_vm15 = vmpackc.low %vm93_vm8, %vm89_vm7  ;;  %vm104_vm6 = vcmp.eq.s32.totalorder %v1997_v16, %v1961_v11  ;;  %vm108_vm7 = vcmp.eq.s32.totalorder %v2000_v17, %v1961_v11  ;;  %vm106_vm9 = vcmp.eq.s32.totalorder %v1997_v16, %v1965_v12  ;;  %vm103_vm12 = vcmp.eq.s32.totalorder %v1997_v16, %v1969_v13 }
  0x43   :  { %1664 = vmatpush1.bf16.msk.msra.mxu1 %vm1663_vm15, %v1882_v15  ;;  %vm1633_vm2 = vmpackc.low %vm100_vm11, %vm96_vm10  ;;  %vm110_vm10 = vcmp.eq.s32.totalorder %v2000_v17, %v1965_v12  ;;  %vm105_vm15 = vcmp.eq.s32.totalorder %v1997_v16, %v1973_v14  ;;  %v2052_v21 = vadd.s32 72, %v1944_v2  ;;  %v2075_v22 = vadd.s32 80, %v1944_v2 }
  0x44   :  { %1634 = vmatprep.subr.msk.bf16.mxu0 %vm1633_vm2, %v1882_v15  ;;  %vm1665_vm5 = vmpackc.low %vm102_vm14, %vm98_vm13  ;;  %vm107_vm13 = vcmp.eq.s32.totalorder %v2000_v17, %v1969_v13  ;;  %vm112_vm2 = vcmp.eq.s32.totalorder %v2023_v18, %v1961_v11  ;;  %v2078_v23 = vadd.s32 88, %v1944_v2  ;;  %v2101_v24 = vadd.s32 96, %v1944_v2 }
  0x45   :  { %1666 = vmatprep.subr.msk.bf16.mxu1 %vm1665_vm5, %v1882_v15  ;;  %vm1635_vm8 = vmpackc.low %vm99_vm1, %vm95_vm0  ;;  %vm109_vm0 = vcmp.eq.s32.totalorder %v2000_v17, %v1973_v14  ;;  %vm114_vm5 = vcmp.eq.s32.totalorder %v2023_v18, %v1965_v12  ;;  %v2104_v25 = vadd.s32 104, %v1944_v2  ;;  %v2127_v26 = vadd.s32 112, %v1944_v2 }
  0x46   :  { %1636 = vmatpush1.bf16.msk.msra.mxu0 %vm1635_vm8, %v1882_v15  ;;  %vm1667_vm11 = vmpackc.low %vm101_vm4, %vm97_vm3  ;;  %vm116_vm3 = vcmp.eq.s32.totalorder %v2026_v19, %v1961_v11  ;;  %vm111_vm8 = vcmp.eq.s32.totalorder %v2023_v18, %v1969_v13  ;;  %v2130_v27 = vadd.s32 120, %v1944_v2  ;;  %v2154_v29 = vrot.slane %v53_v28, %v77_v3 }
  0x47   :  { %1668 = vmatpush1.bf16.msk.msra.mxu1 %vm1667_vm11, %v1882_v15  ;;  %vm1637_vm14 = vmpackc.low %vm108_vm7, %vm104_vm6  ;;  %vm118_vm6 = vcmp.eq.s32.totalorder %v2026_v19, %v1965_v12  ;;  %vm113_vm11 = vcmp.eq.s32.totalorder %v2023_v18, %v1973_v14  ;;  %v2163_v30 = vrot.slane %v53_v28, %v85_v4  ;;  %v2172_v31 = vrot.slane %v53_v28, %v73_v5 }
  0x48   :  { %1638 = vmatprep.subr.msk.bf16.mxu0 %vm1637_vm14, %v1882_v15  ;;  %vm1669_vm1 = vmpackc.low %vm110_vm10, %vm106_vm9  ;;  %vm115_vm9 = vcmp.eq.s32.totalorder %v2026_v19, %v1969_v13  ;;  %vm120_vm14 = vcmp.eq.s32.totalorder %v2049_v20, %v1961_v11  ;;  %v2181_v32 = vrot.slane %v53_v28, %v81_v6 }
  0x49   :  { %1670 = vmatprep.subr.msk.bf16.mxu1 %vm1669_vm1, %v1882_v15  ;;  %vm1639_vm4 = vmpackc.low %vm107_vm13, %vm103_vm12  ;;  %vm117_vm12 = vcmp.eq.s32.totalorder %v2026_v19, %v1973_v14  ;;  %vm122_vm1 = vcmp.eq.s32.totalorder %v2049_v20, %v1965_v12 }
  0x4a   :  { %1640 = vmatpush1.bf16.msk.msra.mxu0 %vm1639_vm4, %v1882_v15  ;;  %vm1671_vm7 = vmpackc.low %vm109_vm0, %vm105_vm15  ;;  %vm124_vm15 = vcmp.eq.s32.totalorder %v2052_v21, %v1961_v11  ;;  %vm119_vm4 = vcmp.eq.s32.totalorder %v2049_v20, %v1969_v13 }
  0x4b   :  { %1672 = vmatpush1.bf16.msk.msra.mxu1 %vm1671_vm7, %v1882_v15  ;;  %vm1641_vm10 = vmpackc.low %vm116_vm3, %vm112_vm2  ;;  %vm126_vm2 = vcmp.eq.s32.totalorder %v2052_v21, %v1965_v12  ;;  %vm121_vm7 = vcmp.eq.s32.totalorder %v2049_v20, %v1973_v14 }
  0x4c   :  { %1642 = vmatprep.subr.msk.bf16.mxu0 %vm1641_vm10, %v1882_v15  ;;  %vm1673_vm13 = vmpackc.low %vm118_vm6, %vm114_vm5  ;;  %vm123_vm5 = vcmp.eq.s32.totalorder %v2052_v21, %v1969_v13  ;;  %vm128_vm10 = vcmp.eq.s32.totalorder %v2075_v22, %v1961_v11 }
  0x4d   :  { %1674 = vmatprep.subr.msk.bf16.mxu1 %vm1673_vm13, %v1882_v15  ;;  %vm1643_vm0 = vmpackc.low %vm115_vm9, %vm111_vm8  ;;  %vm125_vm8 = vcmp.eq.s32.totalorder %v2052_v21, %v1973_v14  ;;  %vm130_vm13 = vcmp.eq.s32.totalorder %v2075_v22, %v1965_v12 }
  0x4e   :  { %1644 = vmatpush1.bf16.msk.msra.mxu0 %vm1643_vm0, %v1882_v15  ;;  %vm1675_vm3 = vmpackc.low %vm117_vm12, %vm113_vm11  ;;  %vm132_vm11 = vcmp.eq.s32.totalorder %v2078_v23, %v1961_v11  ;;  %vm127_vm0 = vcmp.eq.s32.totalorder %v2075_v22, %v1969_v13 }
  0x4f   :  { %1676 = vmatpush1.bf16.msk.msra.mxu1 %vm1675_vm3, %v1882_v15  ;;  %vm1645_vm6 = vmpackc.low %vm124_vm15, %vm120_vm14  ;;  %vm134_vm14 = vcmp.eq.s32.totalorder %v2078_v23, %v1965_v12  ;;  %vm129_vm3 = vcmp.eq.s32.totalorder %v2075_v22, %v1973_v14 }
  0x50   :  { %1646 = vmatprep.subr.msk.bf16.mxu0 %vm1645_vm6, %v1882_v15  ;;  %vm1677_vm9 = vmpackc.low %vm126_vm2, %vm122_vm1  ;;  %vm131_vm1 = vcmp.eq.s32.totalorder %v2078_v23, %v1969_v13  ;;  %vm136_vm6 = vcmp.eq.s32.totalorder %v2101_v24, %v1961_v11 }
  0x51   :  { %1678 = vmatprep.subr.msk.bf16.mxu1 %vm1677_vm9, %v1882_v15  ;;  %vm1647_vm12 = vmpackc.low %vm123_vm5, %vm119_vm4  ;;  %vm133_vm4 = vcmp.eq.s32.totalorder %v2078_v23, %v1973_v14  ;;  %vm138_vm9 = vcmp.eq.s32.totalorder %v2101_v24, %v1965_v12 }
  0x52   :  { %1648 = vmatpush1.bf16.msk.msra.mxu0 %vm1647_vm12, %v1882_v15  ;;  %vm1679_vm15 = vmpackc.low %vm125_vm8, %vm121_vm7  ;;  %vm140_vm7 = vcmp.eq.s32.totalorder %v2104_v25, %v1961_v11  ;;  %vm135_vm12 = vcmp.eq.s32.totalorder %v2101_v24, %v1969_v13 }
  0x53   :  { %1680 = vmatpush1.bf16.msk.msra.mxu1 %vm1679_vm15, %v1882_v15  ;;  %vm1649_vm2 = vmpackc.low %vm132_vm11, %vm128_vm10  ;;  %vm142_vm10 = vcmp.eq.s32.totalorder %v2104_v25, %v1965_v12  ;;  %vm137_vm15 = vcmp.eq.s32.totalorder %v2101_v24, %v1973_v14 }
  0x54   :  { %1650 = vmatprep.subr.msk.bf16.mxu0 %vm1649_vm2, %v1882_v15  ;;  %vm1681_vm5 = vmpackc.low %vm134_vm14, %vm130_vm13  ;;  %vm139_vm13 = vcmp.eq.s32.totalorder %v2104_v25, %v1969_v13  ;;  %vm144_vm2 = vcmp.eq.s32.totalorder %v2127_v26, %v1961_v11 }
  0x55   :  { %1682 = vmatprep.subr.msk.bf16.mxu1 %vm1681_vm5, %v1882_v15  ;;  %vm1651_vm8 = vmpackc.low %vm131_vm1, %vm127_vm0  ;;  %vm141_vm0 = vcmp.eq.s32.totalorder %v2104_v25, %v1973_v14  ;;  %vm146_vm5 = vcmp.eq.s32.totalorder %v2127_v26, %v1965_v12 }
  0x56   :  { %1652 = vmatpush1.bf16.msk.msra.mxu0 %vm1651_vm8, %v1882_v15  ;;  %vm1683_vm11 = vmpackc.low %vm133_vm4, %vm129_vm3  ;;  %vm148_vm3 = vcmp.eq.s32.totalorder %v2130_v27, %v1961_v11  ;;  %vm143_vm8 = vcmp.eq.s32.totalorder %v2127_v26, %v1969_v13 }
  0x57   :  { %1684 = vmatpush1.bf16.msk.msra.mxu1 %vm1683_vm11, %v1882_v15  ;;  %vm1653_vm14 = vmpackc.low %vm140_vm7, %vm136_vm6  ;;  %vm150_vm6 = vcmp.eq.s32.totalorder %v2130_v27, %v1965_v12  ;;  %vm145_vm11 = vcmp.eq.s32.totalorder %v2127_v26, %v1973_v14 }
  0x58   :  { %1654 = vmatprep.subr.msk.bf16.mxu0 %vm1653_vm14, %v1882_v15  ;;  %vm1685_vm1 = vmpackc.low %vm142_vm10, %vm138_vm9  ;;  %vm147_vm9 = vcmp.eq.s32.totalorder %v2130_v27, %v1969_v13  ;;  %vm296_vm14 = vcmp.eq.s32.totalorder %v1944_v2, %v2154_v29 }
  0x59   :  { %1686 = vmatprep.subr.msk.bf16.mxu1 %vm1685_vm1, %v1882_v15  ;;  %vm1655_vm4 = vmpackc.low %vm139_vm13, %vm135_vm12  ;;  %vm149_vm12 = vcmp.eq.s32.totalorder %v2130_v27, %v1973_v14  ;;  %vm298_vm1 = vcmp.eq.s32.totalorder %v1944_v2, %v2163_v30 }
  0x5a   :  { %1656 = vmatpush1.bf16.msk.msra.mxu0 %vm1655_vm4, %v1882_v15  ;;  %vm1687_vm7 = vmpackc.low %vm141_vm0, %vm137_vm15  ;;  %vm300_vm15 = vcmp.eq.s32.totalorder %v1951_v7, %v2154_v29  ;;  %vm295_vm4 = vcmp.eq.s32.totalorder %v1944_v2, %v2172_v31 }
  0x5b   :  { %1688 = vmatpush1.bf16.msk.msra.mxu1 %vm1687_vm7, %v1882_v15  ;;  %vm1657_vm10 = vmpackc.low %vm148_vm3, %vm144_vm2  ;;  %vm302_vm2 = vcmp.eq.s32.totalorder %v1951_v7, %v2163_v30  ;;  %vm297_vm7 = vcmp.eq.s32.totalorder %v1944_v2, %v2181_v32 }
  0x5c   :  { %1658 = vmatprep.subr.msk.bf16.mxu0 %vm1657_vm10, %v1882_v15  ;;  %vm1689_vm13 = vmpackc.low %vm150_vm6, %vm146_vm5  ;;  %vm299_vm5 = vcmp.eq.s32.totalorder %v1951_v7, %v2172_v31  ;;  %vm304_vm10 = vcmp.eq.s32.totalorder %v1954_v9, %v2154_v29 }
  0x5d   :  { %1690 = vmatprep.subr.msk.bf16.mxu1 %vm1689_vm13, %v1882_v15  ;;  %vm1659_vm0 = vmpackc.low %vm147_vm9, %vm143_vm8  ;;  %vm301_vm8 = vcmp.eq.s32.totalorder %v1951_v7, %v2181_v32  ;;  %vm306_vm13 = vcmp.eq.s32.totalorder %v1954_v9, %v2163_v30 }
  0x5e   :  { %1660 = vmatpush1.bf16.msk.msra.mxu0 %vm1659_vm0, %v1882_v15  ;;  %vm1691_vm3 = vmpackc.low %vm149_vm12, %vm145_vm11  ;;  %vm308_vm11 = vcmp.eq.s32.totalorder %v1957_v10, %v2154_v29  ;;  %vm303_vm0 = vcmp.eq.s32.totalorder %v1954_v9, %v2172_v31 }
  0x5f   :  { %1692 = vmatpush1.bf16.msk.msra.mxu1 %vm1691_vm3, %v1882_v15  ;;  %vm1693_vm6 = vmpackc.low %vm300_vm15, %vm296_vm14  ;;  %vm310_vm14 = vcmp.eq.s32.totalorder %v1957_v10, %v2163_v30  ;;  %vm305_vm3 = vcmp.eq.s32.totalorder %v1954_v9, %v2181_v32 }
  0x60   :  { %1694 = vmatprep.subr.msk.bf16.mxu0 %vm1693_vm6, %v1882_v15  ;;  %vm1725_vm9 = vmpackc.low %vm302_vm2, %vm298_vm1  ;;  %vm307_vm1 = vcmp.eq.s32.totalorder %v1957_v10, %v2172_v31  ;;  %vm312_vm6 = vcmp.eq.s32.totalorder %v1997_v16, %v2154_v29 }
  0x61   :  { %568 = vmatmul.mubr.f32.vlgmr.msra.gmra.mrb[0].mxu0 %v2194_v33  ;;  %1726 = vmatprep.subr.msk.bf16.mxu1 %vm1725_vm9, %v1882_v15  ;;  %vm1695_vm12 = vmpackc.low %vm299_vm5, %vm295_vm4  ;;  %vm309_vm4 = vcmp.eq.s32.totalorder %v1957_v10, %v2181_v32  ;;  %vm314_vm9 = vcmp.eq.s32.totalorder %v1997_v16, %v2163_v30 }
  0x62   :  { %729 = vmatmul.mubr.f32.vlgmr.msra.gmra.mrb[0].mxu1 %v2194_v33  ;;  %1696 = vmatpush1.bf16.msk.msra.mxu0 %vm1695_vm12, %v1882_v15  ;;  %vm1727_vm15 = vmpackc.low %vm301_vm8, %vm297_vm7  ;;  %vm316_vm7 = vcmp.eq.s32.totalorder %v2000_v17, %v2154_v29  ;;  %vm311_vm12 = vcmp.eq.s32.totalorder %v1997_v16, %v2172_v31 }
  0x63   :  { %1728 = vmatpush1.bf16.msk.msra.mxu1 %vm1727_vm15, %v1882_v15  ;;  %573 = vmatprep.mubr.f32.mxu0 %v1881_v1  ;;  %vm1697_vm2 = vmpackc.low %vm308_vm11, %vm304_vm10  ;;  %vm318_vm10 = vcmp.eq.s32.totalorder %v2000_v17, %v2163_v30  ;;  %vm313_vm15 = vcmp.eq.s32.totalorder %v1997_v16, %v2181_v32 }
  0x64   :  { %734 = vmatprep.mubr.f32.mxu1 %v1881_v1  ;;  %1698 = vmatprep.subr.msk.bf16.mxu0 %vm1697_vm2, %v1882_v15  ;;  %vm1729_vm5 = vmpackc.low %vm310_vm14, %vm306_vm13  ;;  %vm315_vm13 = vcmp.eq.s32.totalorder %v2000_v17, %v2172_v31  ;;  %vm320_vm2 = vcmp.eq.s32.totalorder %v2023_v18, %v2154_v29 }
  0x65   :  { %574 = vmatmul.mubr.f32.gmra.mrb[2].mxu0 %v2218_v34  ;;  %1730 = vmatprep.subr.msk.bf16.mxu1 %vm1729_vm5, %v1882_v15  ;;  %vm1699_vm8 = vmpackc.low %vm307_vm1, %vm303_vm0  ;;  %vm317_vm0 = vcmp.eq.s32.totalorder %v2000_v17, %v2181_v32  ;;  %vm322_vm5 = vcmp.eq.s32.totalorder %v2023_v18, %v2163_v30 }
  0x66   :  { %735 = vmatmul.mubr.f32.gmra.mrb[2].mxu1 %v2218_v34  ;;  %579 = vmatprep.mubr.f32.mxu0 %v1881_v1  ;;  %vm1731_vm11 = vmpackc.low %vm309_vm4, %vm305_vm3  ;;  %vm324_vm3 = vcmp.eq.s32.totalorder %v2026_v19, %v2154_v29 }
  0x67   :  { %740 = vmatprep.mubr.f32.mxu1 %v1881_v1  ;;  %1700 = vmatpush1.bf16.msk.msra.mxu0 %vm1699_vm8, %v1882_v15  ;;  %vm1701_vm14 = vmpackc.low %vm316_vm7, %vm312_vm6  ;;  %vm326_vm6 = vcmp.eq.s32.totalorder %v2026_v19, %v2163_v30  ;;  %vm319_vm8 = vcmp.eq.s32.totalorder %v2023_v18, %v2172_v31 }
  0x68   :  { %1732 = vmatpush1.bf16.msk.msra.mxu1 %vm1731_vm11, %v1882_v15  ;;  %1702 = vmatprep.subr.msk.bf16.mxu0 %vm1701_vm14, %v1882_v15  ;;  %vm1733_vm1 = vmpackc.low %vm318_vm10, %vm314_vm9  ;;  %vm323_vm9 = vcmp.eq.s32.totalorder %v2026_v19, %v2172_v31  ;;  %vm321_vm11 = vcmp.eq.s32.totalorder %v2023_v18, %v2181_v32  ;;  %vm328_vm14 = vcmp.eq.s32.totalorder %v2049_v20, %v2154_v29 }
  0x69   :  { %580 = vmatmul.mubr.f32.gmra.mrb[4].mxu0 %v2250_v35  ;;  %1734 = vmatprep.subr.msk.bf16.mxu1 %vm1733_vm1, %v1882_v15  ;;  %vm1703_vm4 = vmpackc.low %vm315_vm13, %vm311_vm12  ;;  %vm325_vm12 = vcmp.eq.s32.totalorder %v2026_v19, %v2181_v32  ;;  %vm330_vm1 = vcmp.eq.s32.totalorder %v2049_v20, %v2163_v30 }
  0x6a   :  { %741 = vmatmul.mubr.f32.gmra.mrb[4].mxu1 %v2250_v35  ;;  %585 = vmatprep.mubr.f32.mxu0 %v1881_v1  ;;  %vm1735_vm7 = vmpackc.low %vm317_vm0, %vm313_vm15  ;;  %vm332_vm15 = vcmp.eq.s32.totalorder %v2052_v21, %v2154_v29 }
  0x6b   :  { %746 = vmatprep.mubr.f32.mxu1 %v1881_v1  ;;  %1704 = vmatpush1.bf16.msk.msra.mxu0 %vm1703_vm4, %v1882_v15  ;;  %vm1705_vm10 = vmpackc.low %vm324_vm3, %vm320_vm2  ;;  %vm334_vm2 = vcmp.eq.s32.totalorder %v2052_v21, %v2163_v30  ;;  %vm327_vm4 = vcmp.eq.s32.totalorder %v2049_v20, %v2172_v31 }
  0x6c   :  { %1736 = vmatpush1.bf16.msk.msra.mxu1 %vm1735_vm7, %v1882_v15  ;;  %1706 = vmatprep.subr.msk.bf16.mxu0 %vm1705_vm10, %v1882_v15  ;;  %vm1737_vm13 = vmpackc.low %vm326_vm6, %vm322_vm5  ;;  %vm331_vm5 = vcmp.eq.s32.totalorder %v2052_v21, %v2172_v31  ;;  %vm329_vm7 = vcmp.eq.s32.totalorder %v2049_v20, %v2181_v32  ;;  %vm336_vm10 = vcmp.eq.s32.totalorder %v2075_v22, %v2154_v29 }
  0x6d   :  { %586 = vmatmul.mubr.f32.gmra.mrb[6].mxu0 %v2285_v36  ;;  %1738 = vmatprep.subr.msk.bf16.mxu1 %vm1737_vm13, %v1882_v15  ;;  %vm1707_vm0 = vmpackc.low %vm323_vm9, %vm319_vm8  ;;  %vm333_vm8 = vcmp.eq.s32.totalorder %v2052_v21, %v2181_v32  ;;  %vm338_vm13 = vcmp.eq.s32.totalorder %v2075_v22, %v2163_v30 }
  0x6e   :  { %747 = vmatmul.mubr.f32.gmra.mrb[6].mxu1 %v2285_v36  ;;  %591 = vmatprep.mubr.f32.mxu0 %v1881_v1  ;;  %vm1739_vm3 = vmpackc.low %vm325_vm12, %vm321_vm11  ;;  %vm340_vm11 = vcmp.eq.s32.totalorder %v2078_v23, %v2154_v29 }
  0x6f   :  { %752 = vmatprep.mubr.f32.mxu1 %v1881_v1  ;;  %1708 = vmatpush1.bf16.msk.msra.mxu0 %vm1707_vm0, %v1882_v15  ;;  %vm1709_vm6 = vmpackc.low %vm332_vm15, %vm328_vm14  ;;  %vm342_vm14 = vcmp.eq.s32.totalorder %v2078_v23, %v2163_v30  ;;  %vm335_vm0 = vcmp.eq.s32.totalorder %v2075_v22, %v2172_v31 }
  0x70   :  { %1740 = vmatpush1.bf16.msk.msra.mxu1 %vm1739_vm3, %v1882_v15  ;;  %1710 = vmatprep.subr.msk.bf16.mxu0 %vm1709_vm6, %v1882_v15  ;;  %vm1741_vm9 = vmpackc.low %vm334_vm2, %vm330_vm1  ;;  %vm339_vm1 = vcmp.eq.s32.totalorder %v2078_v23, %v2172_v31  ;;  %vm337_vm3 = vcmp.eq.s32.totalorder %v2075_v22, %v2181_v32  ;;  %vm344_vm6 = vcmp.eq.s32.totalorder %v2101_v24, %v2154_v29 }
  0x71   :  { %592 = vmatmul.mubr.f32.gmra.mrb[8].mxu0 %v2320_v37  ;;  %1742 = vmatprep.subr.msk.bf16.mxu1 %vm1741_vm9, %v1882_v15  ;;  %vm1711_vm12 = vmpackc.low %vm331_vm5, %vm327_vm4  ;;  %vm341_vm4 = vcmp.eq.s32.totalorder %v2078_v23, %v2181_v32  ;;  %vm346_vm9 = vcmp.eq.s32.totalorder %v2101_v24, %v2163_v30 }
  0x72   :  { %753 = vmatmul.mubr.f32.gmra.mrb[8].mxu1 %v2320_v37  ;;  %597 = vmatprep.mubr.f32.mxu0 %v1881_v1  ;;  %vm1743_vm15 = vmpackc.low %vm333_vm8, %vm329_vm7  ;;  %vm348_vm7 = vcmp.eq.s32.totalorder %v2104_v25, %v2154_v29 }
  0x73   :  { %758 = vmatprep.mubr.f32.mxu1 %v1881_v1  ;;  %1712 = vmatpush1.bf16.msk.msra.mxu0 %vm1711_vm12, %v1882_v15  ;;  %vm1713_vm2 = vmpackc.low %vm340_vm11, %vm336_vm10  ;;  %vm350_vm10 = vcmp.eq.s32.totalorder %v2104_v25, %v2163_v30  ;;  %vm343_vm12 = vcmp.eq.s32.totalorder %v2101_v24, %v2172_v31 }
  0x74   :  { %1744 = vmatpush1.bf16.msk.msra.mxu1 %vm1743_vm15, %v1882_v15  ;;  %1714 = vmatprep.subr.msk.bf16.mxu0 %vm1713_vm2, %v1882_v15  ;;  %vm1745_vm5 = vmpackc.low %vm342_vm14, %vm338_vm13  ;;  %vm347_vm13 = vcmp.eq.s32.totalorder %v2104_v25, %v2172_v31  ;;  %vm345_vm15 = vcmp.eq.s32.totalorder %v2101_v24, %v2181_v32  ;;  %vm352_vm2 = vcmp.eq.s32.totalorder %v2127_v26, %v2154_v29 }
  0x75   :  { %598 = vmatmul.mubr.f32.gmra.mrb[10].mxu0 %v2355_v38  ;;  %1746 = vmatprep.subr.msk.bf16.mxu1 %vm1745_vm5, %v1882_v15  ;;  %vm1715_vm8 = vmpackc.low %vm339_vm1, %vm335_vm0  ;;  %vm349_vm0 = vcmp.eq.s32.totalorder %v2104_v25, %v2181_v32  ;;  %vm354_vm5 = vcmp.eq.s32.totalorder %v2127_v26, %v2163_v30 }
  0x76   :  { %759 = vmatmul.mubr.f32.gmra.mrb[10].mxu1 %v2355_v38  ;;  %603 = vmatprep.mubr.f32.mxu0 %v1881_v1  ;;  %vm1747_vm11 = vmpackc.low %vm341_vm4, %vm337_vm3  ;;  %vm356_vm3 = vcmp.eq.s32.totalorder %v2130_v27, %v2154_v29 }
  0x77   :  { %764 = vmatprep.mubr.f32.mxu1 %v1881_v1  ;;  %1716 = vmatpush1.bf16.msk.msra.mxu0 %vm1715_vm8, %v1882_v15  ;;  %vm1717_vm14 = vmpackc.low %vm348_vm7, %vm344_vm6  ;;  %vm358_vm6 = vcmp.eq.s32.totalorder %v2130_v27, %v2163_v30  ;;  %vm351_vm8 = vcmp.eq.s32.totalorder %v2127_v26, %v2172_v31 }
  0x78   :  { %1748 = vmatpush1.bf16.msk.msra.mxu1 %vm1747_vm11, %v1882_v15  ;;  %1718 = vmatprep.subr.msk.bf16.mxu0 %vm1717_vm14, %v1882_v15  ;;  %vm1749_vm1 = vmpackc.low %vm350_vm10, %vm346_vm9  ;;  %vm355_vm9 = vcmp.eq.s32.totalorder %v2130_v27, %v2172_v31  ;;  %vm353_vm11 = vcmp.eq.s32.totalorder %v2127_v26, %v2181_v32 }
  0x79   :  { %604 = vmatmul.mubr.f32.gmra.mrb[12].mxu0 %v2390_v39  ;;  %1750 = vmatprep.subr.msk.bf16.mxu1 %vm1749_vm1, %v1882_v15  ;;  %vm1719_vm4 = vmpackc.low %vm347_vm13, %vm343_vm12  ;;  %vm357_vm12 = vcmp.eq.s32.totalorder %v2130_v27, %v2181_v32 }
  0x7a   :  { %765 = vmatmul.mubr.f32.gmra.mrb[12].mxu1 %v2390_v39  ;;  %609 = vmatprep.mubr.f32.mxu0 %v1881_v1  ;;  %vm1751_vm7 = vmpackc.low %vm349_vm0, %vm345_vm15 }
  0x7b   :  { %770 = vmatprep.mubr.f32.mxu1 %v1881_v1  ;;  %1720 = vmatpush1.bf16.msk.msra.mxu0 %vm1719_vm4, %v1882_v15  ;;  %vm1721_vm10 = vmpackc.low %vm356_vm3, %vm352_vm2 }
  0x7c   :  { %1752 = vmatpush1.bf16.msk.msra.mxu1 %vm1751_vm7, %v1882_v15  ;;  %1722 = vmatprep.subr.msk.bf16.mxu0 %vm1721_vm10, %v1882_v15  ;;  %vm1753_vm13 = vmpackc.low %vm358_vm6, %vm354_vm5 }
  0x7d   :  { %610 = vmatmul.mubr.f32.gmra.mrb[14].mxu0 %v2425_v40  ;;  %1754 = vmatprep.subr.msk.bf16.mxu1 %vm1753_vm13, %v1882_v15  ;;  %vm1723_vm14 = vmpackc.low %vm355_vm9, %vm351_vm8 }
  0x7e   :  { %771 = vmatmul.mubr.f32.gmra.mrb[14].mxu1 %v2425_v40  ;;  %615 = vmatprep.mubr.f32.mxu0 %v1881_v1  ;;  %vm1755_vm15 = vmpackc.low %vm357_vm12, %vm353_vm11 }
  0x7f   :  { %776 = vmatprep.mubr.f32.mxu1 %v1881_v1  ;;  %1724 = vmatpush1.bf16.msk.msra.mxu0 %vm1723_vm14, %v1882_v15 }
  0x80   :  { %1756 = vmatpush1.bf16.msk.msra.mxu1 %vm1755_vm15, %v1882_v15 }
  0x81   :  { %616 = vmatmul.mubr.f32.gmra.mrb[16].mxu0 %v2452_v41 }
  0x82   :  { %777 = vmatmul.mubr.f32.gmra.mrb[16].mxu1 %v2452_v41  ;;  %621 = vmatprep.mubr.f32.mxu0 %v1881_v1 }
  0x83   :  { %782 = vmatprep.mubr.f32.mxu1 %v1881_v1 }
  0x85   :  { %622 = vmatmul.mubr.f32.gmra.mrb[18].mxu0 %v2460_v42 }
  0x86   :  { %783 = vmatmul.mubr.f32.gmra.mrb[18].mxu1 %v2460_v42  ;;  %627 = vmatprep.mubr.f32.mxu0 %v1881_v1 }
  0x87   :  { %788 = vmatprep.mubr.f32.mxu1 %v1881_v1 }
  0x89   :  { %628 = vmatmul.mubr.f32.gmra.mrb[20].mxu0 %v2466_v43 }
  0x8a   :  { %789 = vmatmul.mubr.f32.gmra.mrb[20].mxu1 %v2466_v43  ;;  %633 = vmatprep.mubr.f32.mxu0 %v1881_v1 }
  0x8b   :  { %794 = vmatprep.mubr.f32.mxu1 %v1881_v1 }
  0x8d   :  { %634 = vmatmul.mubr.f32.gmra.mrb[22].mxu0 %v2472_v44 }
  0x8e   :  { %795 = vmatmul.mubr.f32.gmra.mrb[22].mxu1 %v2472_v44  ;;  %639 = vmatprep.mubr.f32.mxu0 %v1881_v1 }
  0x8f   :  { %800 = vmatprep.mubr.f32.mxu1 %v1881_v1 }
  0x91   :  { %640 = vmatmul.mubr.f32.gmra.mrb[24].mxu0 %v2478_v45 }
  0x92   :  { %801 = vmatmul.mubr.f32.gmra.mrb[24].mxu1 %v2478_v45  ;;  %645 = vmatprep.mubr.f32.mxu0 %v1881_v1 }
  0x93   :  { %806 = vmatprep.mubr.f32.mxu1 %v1881_v1 }
  0x95   :  { %646 = vmatmul.mubr.f32.gmra.mrb[26].mxu0 %v2484_v46 }
  0x96   :  { %807 = vmatmul.mubr.f32.gmra.mrb[26].mxu1 %v2484_v46  ;;  %651 = vmatprep.mubr.f32.mxu0 %v1881_v1 }
  0x97   :  { %812 = vmatprep.mubr.f32.mxu1 %v1881_v1 }
  0x99   :  { %652 = vmatmul.mubr.f32.gmra.mrb[28].mxu0 %v2490_v47 }
  0x9a   :  { %813 = vmatmul.mubr.f32.gmra.mrb[28].mxu1 %v2490_v47  ;;  %657 = vmatprep.mubr.f32.mxu0 %v1881_v1 }
  0x9b   :  { %818 = vmatprep.mubr.f32.mxu1 %v1881_v1 }
  0x9d   :  { %658 = vmatmul.mubr.f32.gmra.mrb[30].mxu0 %v2496_v48 }
  0x9e   :  { %819 = vmatmul.mubr.f32.gmra.mrb[30].mxu1 %v2496_v48  ;;  %889 = vmatprep.mubr.f32.mxu0 %v1881_v1 }
  0x9f   :  { %1050 = vmatprep.mubr.f32.mxu1 %v1881_v1 }
  0xa1   :  { %890 = vmatmul.mubr.f32.vlgmr.msra.gmra.mrb[32].mxu0 %v2194_v33 }
  0xa2   :  { %1051 = vmatmul.mubr.f32.vlgmr.msra.gmra.mrb[32].mxu1 %v2194_v33  ;;  %895 = vmatprep.mubr.f32.mxu0 %v1881_v1 }
  0xa3   :  { %1056 = vmatprep.mubr.f32.mxu1 %v1881_v1 }
  0xa5   :  { %896 = vmatmul.mubr.f32.gmra.mrb[34].mxu0 %v2218_v34 }
  0xa6   :  { %1057 = vmatmul.mubr.f32.gmra.mrb[34].mxu1 %v2218_v34  ;;  %901 = vmatprep.mubr.f32.mxu0 %v1881_v1 }
  0xa7   :  { %1062 = vmatprep.mubr.f32.mxu1 %v1881_v1 }
  0xa9   :  { %902 = vmatmul.mubr.f32.gmra.mrb[36].mxu0 %v2250_v35 }
  0xaa   :  { %1063 = vmatmul.mubr.f32.gmra.mrb[36].mxu1 %v2250_v35  ;;  %907 = vmatprep.mubr.f32.mxu0 %v1881_v1 }
  0xab   :  { %1068 = vmatprep.mubr.f32.mxu1 %v1881_v1 }
  0xad   :  { %908 = vmatmul.mubr.f32.gmra.mrb[38].mxu0 %v2285_v36 }
  0xae   :  { %1069 = vmatmul.mubr.f32.gmra.mrb[38].mxu1 %v2285_v36  ;;  %913 = vmatprep.mubr.f32.mxu0 %v1881_v1 }
  0xaf   :  { %1074 = vmatprep.mubr.f32.mxu1 %v1881_v1 }
  0xb1   :  { %914 = vmatmul.mubr.f32.gmra.mrb[40].mxu0 %v2320_v37 }
  0xb2   :  { %1075 = vmatmul.mubr.f32.gmra.mrb[40].mxu1 %v2320_v37  ;;  %919 = vmatprep.mubr.f32.mxu0 %v1881_v1 }
  0xb3   :  { %1080 = vmatprep.mubr.f32.mxu1 %v1881_v1 }
  0xb5   :  { %920 = vmatmul.mubr.f32.gmra.mrb[42].mxu0 %v2355_v38 }
  0xb6   :  { %1081 = vmatmul.mubr.f32.gmra.mrb[42].mxu1 %v2355_v38  ;;  %925 = vmatprep.mubr.f32.mxu0 %v1881_v1 }
  0xb7   :  { %1086 = vmatprep.mubr.f32.mxu1 %v1881_v1 }
  0xb9   :  { %926 = vmatmul.mubr.f32.gmra.mrb[44].mxu0 %v2390_v39 }
  0xba   :  { %1087 = vmatmul.mubr.f32.gmra.mrb[44].mxu1 %v2390_v39  ;;  %931 = vmatprep.mubr.f32.mxu0 %v1881_v1 }
  0xbb   :  { %1092 = vmatprep.mubr.f32.mxu1 %v1881_v1 }
  0xbd   :  { %932 = vmatmul.mubr.f32.gmra.mrb[46].mxu0 %v2425_v40 }
  0xbe   :  { %1093 = vmatmul.mubr.f32.gmra.mrb[46].mxu1 %v2425_v40  ;;  %937 = vmatprep.mubr.f32.mxu0 %v1881_v1 }
  0xbf   :  { %1098 = vmatprep.mubr.f32.mxu1 %v1881_v1 }
  0xc1   :  { %938 = vmatmul.mubr.f32.gmra.mrb[48].mxu0 %v2452_v41 }
  0xc2   :  { %1099 = vmatmul.mubr.f32.gmra.mrb[48].mxu1 %v2452_v41  ;;  %943 = vmatprep.mubr.f32.mxu0 %v1881_v1 }
  0xc3   :  { %1104 = vmatprep.mubr.f32.mxu1 %v1881_v1 }
  0xc5   :  { %944 = vmatmul.mubr.f32.gmra.mrb[50].mxu0 %v2460_v42 }
  0xc6   :  { %1105 = vmatmul.mubr.f32.gmra.mrb[50].mxu1 %v2460_v42  ;;  %949 = vmatprep.mubr.f32.mxu0 %v1881_v1 }
  0xc7   :  { %1110 = vmatprep.mubr.f32.mxu1 %v1881_v1 }
  0xc9   :  { %950 = vmatmul.mubr.f32.gmra.mrb[52].mxu0 %v2466_v43 }
  0xca   :  { %1111 = vmatmul.mubr.f32.gmra.mrb[52].mxu1 %v2466_v43  ;;  %955 = vmatprep.mubr.f32.mxu0 %v1881_v1 }
  0xcb   :  { %1116 = vmatprep.mubr.f32.mxu1 %v1881_v1 }
  0xcd   :  { %956 = vmatmul.mubr.f32.gmra.mrb[54].mxu0 %v2472_v44 }
  0xce   :  { %1117 = vmatmul.mubr.f32.gmra.mrb[54].mxu1 %v2472_v44  ;;  %961 = vmatprep.mubr.f32.mxu0 %v1881_v1 }
  0xcf   :  { %1122 = vmatprep.mubr.f32.mxu1 %v1881_v1 }
  0xd1   :  { %962 = vmatmul.mubr.f32.gmra.mrb[56].mxu0 %v2478_v45 }
  0xd2   :  { %1123 = vmatmul.mubr.f32.gmra.mrb[56].mxu1 %v2478_v45  ;;  %967 = vmatprep.mubr.f32.mxu0 %v1881_v1 }
  0xd3   :  { %1128 = vmatprep.mubr.f32.mxu1 %v1881_v1 }
  0xd5   :  { %968 = vmatmul.mubr.f32.gmra.mrb[58].mxu0 %v2484_v46 }
  0xd6   :  { %1129 = vmatmul.mubr.f32.gmra.mrb[58].mxu1 %v2484_v46  ;;  %973 = vmatprep.mubr.f32.mxu0 %v1881_v1 }
  0xd7   :  { %1134 = vmatprep.mubr.f32.mxu1 %v1881_v1 }
  0xd9   :  { %974 = vmatmul.mubr.f32.gmra.mrb[60].mxu0 %v2490_v47 }
  0xda   :  { %1135 = vmatmul.mubr.f32.gmra.mrb[60].mxu1 %v2490_v47  ;;  %979 = vmatprep.mubr.f32.mxu0 %v1881_v1 }
  0xdb   :  { %1140 = vmatprep.mubr.f32.mxu1 %v1881_v1 }
  0xdd   :  { %980 = vmatmul.mubr.f32.gmra.mrb[62].mxu0 %v2496_v48 }
  0xde   :  { %1141 = vmatmul.mubr.f32.gmra.mrb[62].mxu1 %v2496_v48 }
 0x134   :  { %v2565_v49 = vpop.f32.mrb[0].mxu0 }
 0x135   :  { %v2567_v50 = vpop.f32.mrb[0].mxu1  ;;  %v2569_v51 = vpop.f32.mrb[1].mxu0 }
 0x136   :  { %v2571_v52 = vpop.f32.mrb[1].mxu1 }
 0x138   :  { %v2573_v53 = vpop.f32.mrb[2].mxu0 }
 0x139   :  { %v2575_v54 = vpop.f32.mrb[2].mxu1  ;;  %v2577_v55 = vpop.f32.mrb[3].mxu0 }
 0x13a   :  { %v2579_v56 = vpop.f32.mrb[3].mxu1 }
 0x13c   :  { %v2581_v57 = vpop.f32.mrb[4].mxu0 }
 0x13d   :  { %v2583_v58 = vpop.f32.mrb[4].mxu1  ;;  %v2585_v59 = vpop.f32.mrb[5].mxu0 }
 0x13e   :  { %v2587_v60 = vpop.f32.mrb[5].mxu1 }
 0x140   :  { %v2589_v61 = vpop.f32.mrb[6].mxu0 }
 0x141   :  { %v2591_v62 = vpop.f32.mrb[6].mxu1  ;;  %v2593_v63 = vpop.f32.mrb[7].mxu0 }
 0x142   :  { %v2595_v1 = vpop.f32.mrb[7].mxu1 }
 0x144   :  { %v2597_v3 = vpop.f32.mrb[8].mxu0 }
 0x145   :  { %v2599_v4 = vpop.f32.mrb[8].mxu1  ;;  %v2601_v5 = vpop.f32.mrb[9].mxu0 }
 0x146   :  { %v2603_v6 = vpop.f32.mrb[9].mxu1 }
 0x148   :  { %v2605_v7 = vpop.f32.mrb[10].mxu0 }
 0x149   :  { %v2607_v8 = vpop.f32.mrb[10].mxu1  ;;  %v2609_v9 = vpop.f32.mrb[11].mxu0 }
 0x14a   :  { %v2611_v10 = vpop.f32.mrb[11].mxu1 }
 0x14c   :  { %v2613_v11 = vpop.f32.mrb[12].mxu0 }
 0x14d   :  { %v2615_v12 = vpop.f32.mrb[12].mxu1  ;;  %v2617_v13 = vpop.f32.mrb[13].mxu0 }
 0x14e   :  { %v2619_v14 = vpop.f32.mrb[13].mxu1 }
 0x150   :  { %v2621_v15 = vpop.f32.mrb[14].mxu0 }
 0x151   :  { %v2623_v16 = vpop.f32.mrb[14].mxu1  ;;  %v2625_v17 = vpop.f32.mrb[15].mxu0 }
 0x152   :  { %v2627_v18 = vpop.f32.mrb[15].mxu1 }
 0x154   :  { %v2629_v19 = vpop.f32.mrb[16].mxu0 }
 0x155   :  { %v2631_v20 = vpop.f32.mrb[16].mxu1  ;;  %v2633_v21 = vpop.f32.mrb[17].mxu0 }
 0x156   :  { %v2635_v22 = vpop.f32.mrb[17].mxu1 }
 0x158   :  { %v2637_v23 = vpop.f32.mrb[18].mxu0 }
 0x159   :  { %v2639_v24 = vpop.f32.mrb[18].mxu1  ;;  %v2641_v25 = vpop.f32.mrb[19].mxu0 }
 0x15a   :  { %v2643_v26 = vpop.f32.mrb[19].mxu1 }
 0x15c   :  { %v2645_v27 = vpop.f32.mrb[20].mxu0 }
 0x15d   :  { %v2647_v28 = vpop.f32.mrb[20].mxu1  ;;  %v2649_v29 = vpop.f32.mrb[21].mxu0 }
 0x15e   :  { %v2651_v30 = vpop.f32.mrb[21].mxu1 }
 0x160   :  { %v2653_v31 = vpop.f32.mrb[22].mxu0 }
 0x161   :  { %v2655_v32 = vpop.f32.mrb[22].mxu1  ;;  %v2657_v33 = vpop.f32.mrb[23].mxu0 }
 0x162   :  { %v2659_v34 = vpop.f32.mrb[23].mxu1 }
 0x163   :  { %2778 = vst [vmem:[#allocation13_spill] sm:$0xff] %v2659_v34 }
 0x164   :  { %v2661_v35 = vpop.f32.mrb[24].mxu0 }
 0x165   :  { %2779 = vst [vmem:[#allocation14_spill] sm:$0xff] %v2661_v35  ;;  %v2663_v36 = vpop.f32.mrb[24].mxu1  ;;  %v2665_v37 = vpop.f32.mrb[25].mxu0 }
 0x166   :  { %2780 = vst [vmem:[#allocation15_spill] sm:$0xff] %v2663_v36  ;;  %2781 = vst [vmem:[#allocation16_spill] sm:$0xff] %v2665_v37  ;;  %v2667_v38 = vpop.f32.mrb[25].mxu1 }
 0x167   :  { %2782 = vst [vmem:[#allocation17_spill] sm:$0xff] %v2667_v38 }
 0x168   :  { %v2669_v39 = vpop.f32.mrb[26].mxu0 }
 0x169   :  { %2783 = vst [vmem:[#allocation18_spill] sm:$0xff] %v2669_v39  ;;  %v2671_v40 = vpop.f32.mrb[26].mxu1  ;;  %v2673_v41 = vpop.f32.mrb[27].mxu0 }
 0x16a   :  { %2784 = vst [vmem:[#allocation19_spill] sm:$0xff] %v2671_v40  ;;  %2785 = vst [vmem:[#allocation20_spill] sm:$0xff] %v2673_v41  ;;  %v2675_v42 = vpop.f32.mrb[27].mxu1 }
 0x16b   :  { %2786 = vst [vmem:[#allocation21_spill] sm:$0xff] %v2675_v42 }
 0x16c   :  { %v2677_v43 = vpop.f32.mrb[28].mxu0 }
 0x16d   :  { %2787 = vst [vmem:[#allocation22_spill] sm:$0xff] %v2677_v43  ;;  %v2679_v44 = vpop.f32.mrb[28].mxu1  ;;  %v2681_v45 = vpop.f32.mrb[29].mxu0 }
 0x16e   :  { %2788 = vst [vmem:[#allocation23_spill] sm:$0xff] %v2679_v44  ;;  %2789 = vst [vmem:[#allocation24_spill] sm:$0xff] %v2681_v45  ;;  %v2683_v46 = vpop.f32.mrb[29].mxu1 }
 0x16f   :  { %2790 = vst [vmem:[#allocation25_spill] sm:$0xff] %v2683_v46 }
 0x170   :  { %v2685_v47 = vpop.f32.mrb[30].mxu0 }
 0x171   :  { %2791 = vst [vmem:[#allocation26_spill] sm:$0xff] %v2685_v47  ;;  %v2687_v48 = vpop.f32.mrb[30].mxu1  ;;  %v2689_v0 = vpop.f32.mrb[31].mxu0 }
 0x172   :  { %2792 = vst [vmem:[#allocation27_spill] sm:$0xff] %v2687_v48  ;;  %2793 = vst [vmem:[#allocation28_spill] sm:$0xff] %v2689_v0  ;;  %v2691_v2 = vpop.f32.mrb[31].mxu1 }
 0x173   :  { %2794 = vst [vmem:[#allocation29_spill] sm:$0xff] %v2691_v2 }
 0x174   :  { %v891_v40 = vpop.f32.mrb[32].mxu0 }
 0x175   :  { %v1147_v41 = vmul.f32 %v891_v40, %v2565_v49  ;;  %v1052_v42 = vpop.f32.mrb[32].mxu1  ;;  %v893_v39 = vpop.f32.mrb[33].mxu0 }
 0x176   :  { %v1149_v43 = vmul.f32 %v1052_v42, %v2567_v50  ;;  %v1148_v44 = vmul.f32 %v893_v39, %v2569_v51  ;;  %v1054_v45 = vpop.f32.mrb[33].mxu1 }
 0x177   :  { %v1150_v46 = vmul.f32 %v1054_v45, %v2571_v52 }
 0x178   :  { %v897_v38 = vpop.f32.mrb[34].mxu0 }
 0x179   :  { %v1151_v47 = vmul.f32 %v897_v38, %v2573_v53  ;;  %v1058_v48 = vpop.f32.mrb[34].mxu1  ;;  %v899_v37 = vpop.f32.mrb[35].mxu0 }
 0x17a   :  { %v1153_v0 = vmul.f32 %v1058_v48, %v2575_v54  ;;  %v1152_v2 = vmul.f32 %v899_v37, %v2577_v55  ;;  %v1060_v36 = vpop.f32.mrb[35].mxu1 }
 0x17b   :  { %v1211_v49 = vadd.f32 %v1151_v47, %v1147_v41  ;;  %v1154_v40 = vmul.f32 %v1060_v36, %v2579_v56 }
 0x17c   :  { %v1253_v35 = vadd.f32 %v1153_v0, %v1149_v43  ;;  %v1232_v50 = vadd.f32 %v1152_v2, %v1148_v44  ;;  %v903_v42 = vpop.f32.mrb[36].mxu0 }
 0x17d   :  { %v1274_v51 = vadd.f32 %v1154_v40, %v1150_v46  ;;  %v1155_v39 = vmul.f32 %v903_v42, %v2581_v57  ;;  %v1064_v52 = vpop.f32.mrb[36].mxu1  ;;  %v905_v45 = vpop.f32.mrb[37].mxu0 }
 0x17e   :  { %v1157_v53 = vmul.f32 %v1064_v52, %v2583_v58  ;;  %v1156_v38 = vmul.f32 %v905_v45, %v2585_v59  ;;  %v1066_v34 = vpop.f32.mrb[37].mxu1 }
 0x17f   :  { %v1212_v54 = vadd.f32 %v1211_v49, %v1155_v39  ;;  %v1158_v55 = vmul.f32 %v1066_v34, %v2587_v60 }
 0x180   :  { %v1254_v37 = vadd.f32 %v1253_v35, %v1157_v53  ;;  %v1233_v41 = vadd.f32 %v1232_v50, %v1156_v38  ;;  %v909_v47 = vpop.f32.mrb[38].mxu0 }
 0x181   :  { %v1275_v56 = vadd.f32 %v1274_v51, %v1158_v55  ;;  %v1159_v0 = vmul.f32 %v909_v47, %v2589_v61  ;;  %v1070_v2 = vpop.f32.mrb[38].mxu1  ;;  %v911_v36 = vpop.f32.mrb[39].mxu0 }
 0x182   :  { %v1161_v57 = vmul.f32 %v1070_v2, %v2591_v62  ;;  %v1160_v43 = vmul.f32 %v911_v36, %v2593_v63  ;;  %v1072_v44 = vpop.f32.mrb[39].mxu1 }
 0x183   :  { %v1213_v58 = vadd.f32 %v1212_v54, %v1159_v0  ;;  %v1162_v59 = vmul.f32 %v1072_v44, %v2595_v1 }
 0x184   :  { %v1255_v46 = vadd.f32 %v1254_v37, %v1161_v57  ;;  %v1234_v48 = vadd.f32 %v1233_v41, %v1160_v43  ;;  %v915_v49 = vpop.f32.mrb[40].mxu0 }
 0x185   :  { %v1276_v60 = vadd.f32 %v1275_v56, %v1162_v59  ;;  %v1163_v34 = vmul.f32 %v915_v49, %v2597_v3  ;;  %v1076_v35 = vpop.f32.mrb[40].mxu1  ;;  %v917_v40 = vpop.f32.mrb[41].mxu0 }
 0x186   :  { %v1165_v61 = vmul.f32 %v1076_v35, %v2599_v4  ;;  %v1164_v50 = vmul.f32 %v917_v40, %v2601_v5  ;;  %v1078_v42 = vpop.f32.mrb[41].mxu1 }
 0x187   :  { %v1214_v62 = vadd.f32 %v1213_v58, %v1163_v34  ;;  %v1166_v63 = vmul.f32 %v1078_v42, %v2603_v6 }
 0x188   :  { %v1256_v51 = vadd.f32 %v1255_v46, %v1165_v61  ;;  %v1235_v39 = vadd.f32 %v1234_v48, %v1164_v50  ;;  %v921_v52 = vpop.f32.mrb[42].mxu0 }
 0x189   :  { %v1277_v1 = vadd.f32 %v1276_v60, %v1166_v63  ;;  %v1167_v45 = vmul.f32 %v921_v52, %v2605_v7  ;;  %v1082_v53 = vpop.f32.mrb[42].mxu1  ;;  %v923_v38 = vpop.f32.mrb[43].mxu0 }
 0x18a   :  { %v1169_v3 = vmul.f32 %v1082_v53, %v2607_v8  ;;  %v1168_v54 = vmul.f32 %v923_v38, %v2609_v9  ;;  %v1084_v55 = vpop.f32.mrb[43].mxu1 }
 0x18b   :  { %v1215_v4 = vadd.f32 %v1214_v62, %v1167_v45  ;;  %v1170_v5 = vmul.f32 %v1084_v55, %v2611_v10 }
 0x18c   :  { %v1257_v37 = vadd.f32 %v1256_v51, %v1169_v3  ;;  %v1236_v41 = vadd.f32 %v1235_v39, %v1168_v54  ;;  %v927_v47 = vpop.f32.mrb[44].mxu0 }
 0x18d   :  { %v1278_v6 = vadd.f32 %v1277_v1, %v1170_v5  ;;  %v1171_v56 = vmul.f32 %v927_v47, %v2613_v11  ;;  %v1088_v0 = vpop.f32.mrb[44].mxu1  ;;  %v929_v2 = vpop.f32.mrb[45].mxu0 }
 0x18e   :  { %v1173_v7 = vmul.f32 %v1088_v0, %v2615_v12  ;;  %v1172_v36 = vmul.f32 %v929_v2, %v2617_v13  ;;  %v1090_v57 = vpop.f32.mrb[45].mxu1 }
 0x18f   :  { %v1216_v8 = vadd.f32 %v1215_v4, %v1171_v56  ;;  %v1174_v9 = vmul.f32 %v1090_v57, %v2619_v14 }
 0x190   :  { %v1258_v43 = vadd.f32 %v1257_v37, %v1173_v7  ;;  %v1237_v44 = vadd.f32 %v1236_v41, %v1172_v36  ;;  %v933_v58 = vpop.f32.mrb[46].mxu0 }
 0x191   :  { %v1279_v10 = vadd.f32 %v1278_v6, %v1174_v9  ;;  %v1175_v59 = vmul.f32 %v933_v58, %v2621_v15  ;;  %v1094_v46 = vpop.f32.mrb[46].mxu1  ;;  %v935_v48 = vpop.f32.mrb[47].mxu0 }
 0x192   :  { %v1177_v11 = vmul.f32 %v1094_v46, %v2623_v16  ;;  %v1176_v49 = vmul.f32 %v935_v48, %v2625_v17  ;;  %v1096_v60 = vpop.f32.mrb[47].mxu1 }
 0x193   :  { %v1217_v12 = vadd.f32 %v1216_v8, %v1175_v59  ;;  %v1178_v13 = vmul.f32 %v1096_v60, %v2627_v18  ;;  %v2796_v59 = vld [vmem:[#allocation14_spill] sm:$0xff]  ;;  %v2798_v60 = vld [vmem:[#allocation16_spill] sm:$0xff] }
 0x194   :  { %v1259_v34 = vadd.f32 %v1258_v43, %v1177_v11  ;;  %v1238_v35 = vadd.f32 %v1237_v44, %v1176_v49  ;;  %v939_v40 = vpop.f32.mrb[48].mxu0  ;;  %v2795_v43 = vld [vmem:[#allocation13_spill] sm:$0xff]  ;;  %v2797_v49 = vld [vmem:[#allocation15_spill] sm:$0xff] }
 0x195   :  { %v1280_v14 = vadd.f32 %v1279_v10, %v1178_v13  ;;  %v1179_v61 = vmul.f32 %v939_v40, %v2629_v19  ;;  %v1100_v50 = vpop.f32.mrb[48].mxu1  ;;  %v941_v42 = vpop.f32.mrb[49].mxu0 }
 0x196   :  { %v1181_v15 = vmul.f32 %v1100_v50, %v2631_v20  ;;  %v1180_v62 = vmul.f32 %v941_v42, %v2633_v21  ;;  %v1102_v63 = vpop.f32.mrb[49].mxu1  ;;  %v2800_v50 = vld [vmem:[#allocation18_spill] sm:$0xff] }
 0x197   :  { %v1218_v16 = vadd.f32 %v1217_v12, %v1179_v61  ;;  %v1182_v17 = vmul.f32 %v1102_v63, %v2635_v22  ;;  %v2801_v63 = vld [vmem:[#allocation19_spill] sm:$0xff] }
 0x198   :  { %v1260_v51 = vadd.f32 %v1259_v34, %v1181_v15  ;;  %v1239_v39 = vadd.f32 %v1238_v35, %v1180_v62  ;;  %v945_v52 = vpop.f32.mrb[50].mxu0  ;;  %v2799_v34 = vld [vmem:[#allocation17_spill] sm:$0xff] }
 0x199   :  { %v1281_v18 = vadd.f32 %v1280_v14, %v1182_v17  ;;  %v1183_v1 = vmul.f32 %v945_v52, %v2637_v23  ;;  %v1106_v45 = vpop.f32.mrb[50].mxu1  ;;  %v947_v53 = vpop.f32.mrb[51].mxu0  ;;  %v2802_v17 = vld [vmem:[#allocation20_spill] sm:$0xff] }
 0x19a   :  { %v1185_v19 = vmul.f32 %v1106_v45, %v2639_v24  ;;  %v1184_v38 = vmul.f32 %v947_v53, %v2641_v25  ;;  %v1108_v3 = vpop.f32.mrb[51].mxu1 }
 0x19b   :  { %v1219_v20 = vadd.f32 %v1218_v16, %v1183_v1  ;;  %v1186_v21 = vmul.f32 %v1108_v3, %v2643_v26  ;;  %v2804_v3 = vld [vmem:[#allocation22_spill] sm:$0xff] }
 0x19c   :  { %v1261_v54 = vadd.f32 %v1260_v51, %v1185_v19  ;;  %v1240_v55 = vadd.f32 %v1239_v39, %v1184_v38  ;;  %v951_v4 = vpop.f32.mrb[52].mxu0 }
 0x19d   :  { %v1282_v22 = vadd.f32 %v1281_v18, %v1186_v21  ;;  %v1187_v5 = vmul.f32 %v951_v4, %v2645_v27  ;;  %v1112_v37 = vpop.f32.mrb[52].mxu1  ;;  %v953_v41 = vpop.f32.mrb[53].mxu0  ;;  %v2803_v18 = vld [vmem:[#allocation21_spill] sm:$0xff] }
 0x19e   :  { %v1189_v23 = vmul.f32 %v1112_v37, %v2647_v28  ;;  %v1188_v47 = vmul.f32 %v953_v41, %v2649_v29  ;;  %v1114_v6 = vpop.f32.mrb[53].mxu1 }
 0x19f   :  { %v1220_v24 = vadd.f32 %v1219_v20, %v1187_v5  ;;  %v1190_v25 = vmul.f32 %v1114_v6, %v2651_v30 }
 0x1a0   :  { %v1262_v56 = vadd.f32 %v1261_v54, %v1189_v23  ;;  %v1241_v0 = vadd.f32 %v1240_v55, %v1188_v47  ;;  %v957_v2 = vpop.f32.mrb[54].mxu0  ;;  %v2805_v55 = vld [vmem:[#allocation23_spill] sm:$0xff]  ;;  %v2807_v23 = vld [vmem:[#allocation25_spill] sm:$0xff] }
 0x1a1   :  { %v1283_v26 = vadd.f32 %v1282_v22, %v1190_v25  ;;  %v1191_v7 = vmul.f32 %v957_v2, %v2653_v31  ;;  %v1118_v36 = vpop.f32.mrb[54].mxu1  ;;  %v959_v57 = vpop.f32.mrb[55].mxu0  ;;  %v2806_v22 = vld [vmem:[#allocation24_spill] sm:$0xff] }
 0x1a2   :  { %v1193_v27 = vmul.f32 %v1118_v36, %v2655_v32  ;;  %v1192_v8 = vmul.f32 %v959_v57, %v2657_v33  ;;  %v1120_v9 = vpop.f32.mrb[55].mxu1  ;;  %v2809_v36 = vld [vmem:[#allocation27_spill] sm:$0xff] }
 0x1a3   :  { %v1221_v28 = vadd.f32 %v1220_v24, %v1191_v7  ;;  %v1194_v29 = vmul.f32 %v1120_v9, %v2795_v43  ;;  %v2811_v43 = vld [vmem:[#allocation29_spill] sm:$0xff] }
 0x1a4   :  { %v1263_v44 = vadd.f32 %v1262_v56, %v1193_v27  ;;  %v1242_v58 = vadd.f32 %v1241_v0, %v1192_v8  ;;  %v963_v10 = vpop.f32.mrb[56].mxu0  ;;  %v2808_v0 = vld [vmem:[#allocation26_spill] sm:$0xff]  ;;  %v2810_v27 = vld [vmem:[#allocation28_spill] sm:$0xff] }
 0x1a5   :  { %v1284_v30 = vadd.f32 %v1283_v26, %v1194_v29  ;;  %v1195_v46 = vmul.f32 %v963_v10, %v2796_v59  ;;  %v1124_v48 = vpop.f32.mrb[56].mxu1  ;;  %v965_v11 = vpop.f32.mrb[57].mxu0 }
 0x1a6   :  { %v1197_v31 = vmul.f32 %v1124_v48, %v2797_v49  ;;  %v1196_v12 = vmul.f32 %v965_v11, %v2798_v60  ;;  %v1126_v13 = vpop.f32.mrb[57].mxu1 }
 0x1a7   :  { %v1222_v32 = vadd.f32 %v1221_v28, %v1195_v46  ;;  %v1198_v33 = vmul.f32 %v1126_v13, %v2799_v34 }
 0x1a8   :  { %v1264_v35 = vadd.f32 %v1263_v44, %v1197_v31  ;;  %v1243_v40 = vadd.f32 %v1242_v58, %v1196_v12  ;;  %v969_v14 = vpop.f32.mrb[58].mxu0 }
 0x1a9   :  { %v1285_v61 = vadd.f32 %v1284_v30, %v1198_v33  ;;  %v1199_v42 = vmul.f32 %v969_v14, %v2800_v50  ;;  %v1130_v15 = vpop.f32.mrb[58].mxu1  ;;  %v971_v62 = vpop.f32.mrb[59].mxu0 }
 0x1aa   :  { %v1201_v16 = vmul.f32 %v1130_v15, %v2801_v63  ;;  %v1200_v51 = vmul.f32 %v971_v62, %v2802_v17  ;;  %v1132_v39 = vpop.f32.mrb[59].mxu1 }
 0x1ab   :  { %v1223_v52 = vadd.f32 %v1222_v32, %v1199_v42  ;;  %v1202_v1 = vmul.f32 %v1132_v39, %v2803_v18 }
 0x1ac   :  { %v1265_v45 = vadd.f32 %v1264_v35, %v1201_v16  ;;  %v1244_v53 = vadd.f32 %v1243_v40, %v1200_v51  ;;  %v975_v19 = vpop.f32.mrb[60].mxu0 }
 0x1ad   :  { %v1286_v38 = vadd.f32 %v1285_v61, %v1202_v1  ;;  %v1203_v20 = vmul.f32 %v975_v19, %v2804_v3  ;;  %v1136_v21 = vpop.f32.mrb[60].mxu1  ;;  %v977_v54 = vpop.f32.mrb[61].mxu0 }
 0x1ae   :  { %v1205_v4 = vmul.f32 %v1136_v21, %v2805_v55  ;;  %v1204_v5 = vmul.f32 %v977_v54, %v2806_v22  ;;  %v1138_v37 = vpop.f32.mrb[61].mxu1  ;;  %v1883_v54 = vmov 1966171168  }
 0x1af   :  { %v1224_v41 = vadd.f32 %v1223_v52, %v1203_v20  ;;  %v1206_v47 = vmul.f32 %v1138_v37, %v2807_v23  ;;  %v1326_v55 = vunpack.c.l.s4 %v1883_v54  ;;  %v2812_v37 = vld [vmem:[#allocation12_spill] sm:$0xff] }
 0x1b0   :  { %v1266_v6 = vadd.f32 %v1265_v45, %v1205_v4  ;;  %v1245_v24 = vadd.f32 %v1244_v53, %v1204_v5  ;;  %v981_v25 = vpop.f32.mrb[62].mxu0 }
 0x1b1   :  { %v1287_v56 = vadd.f32 %v1286_v38, %v1206_v47  ;;  %v1207_v2 = vmul.f32 %v981_v25, %v2808_v0  ;;  %v1142_v26 = vpop.f32.mrb[62].mxu1  ;;  %v983_v7 = vpop.f32.mrb[63].mxu0  ;;  %v1327_v4 = vunpack.c.0.s8 %v1326_v55 }
 0x1b2   :  { %v1209_v57 = vmul.f32 %v1142_v26, %v2809_v36  ;;  %v1208_v8 = vmul.f32 %v983_v7, %v2810_v27  ;;  %v1144_v9 = vpop.f32.mrb[63].mxu1 }
 0x1b3   :  { %v1225_v28 = vadd.f32 %v1224_v41, %v1207_v2  ;;  %v1210_v29 = vmul.f32 %v1144_v9, %v2811_v43  ;;  %v1330_v41 = vsub.s32 %v1327_v4, %v2812_v37  ;;  %v2813_v2 = vlaneseq }
 0x1b4   :  { %v1267_v44 = vadd.f32 %v1266_v6, %v1209_v57  ;;  %v1246_v58 = vadd.f32 %v1245_v24, %v1208_v8 }
 0x1b5   :  { %v1226_v10 = vrot.slane %v1225_v28, 4  ;;  %v1288_v30 = vadd.f32 %v1287_v56, %v1210_v29  ;;  %vm1350_vm0 = vcmp.lt.s32.totalorder %v2813_v2, 512 }
 0x1b6   :  { %v1268_v59 = vrot.slane %v1267_v44, 4  ;;  %v1247_v46 = vrot.slane %v1246_v58, 4 }
 0x1b7   :  { %v1227_v48 = vadd.f32 %v1226_v10, %v1225_v28  ;;  %v1289_v11 = vrot.slane %v1288_v30, 4 }
 0x1b8   :  { %v1269_v49 = vadd.f32 %v1268_v59, %v1267_v44  ;;  %v1248_v31 = vadd.f32 %v1247_v46, %v1246_v58 }
 0x1b9   :  { %v1228_v60 = vrot.slane %v1227_v48, 2  ;;  %v1290_v12 = vadd.f32 %v1289_v11, %v1288_v30 }
 0x1ba   :  { %v1270_v13 = vrot.slane %v1269_v49, 2  ;;  %v1249_v32 = vrot.slane %v1248_v31, 2 }
 0x1bb   :  { %v1229_v34 = vadd.f32 %v1228_v60, %v1227_v48  ;;  %v1291_v33 = vrot.slane %v1290_v12, 2 }
 0x1bc   :  { %v1271_v35 = vadd.f32 %v1270_v13, %v1269_v49  ;;  %v1250_v40 = vadd.f32 %v1249_v32, %v1248_v31 }
 0x1bd   :  { %v1230_v14 = vrot.slane %v1229_v34, 1  ;;  %v1292_v61 = vadd.f32 %v1291_v33, %v1290_v12 }
 0x1be   :  { %v1272_v50 = vrot.slane %v1271_v35, 1  ;;  %v1251_v42 = vrot.slane %v1250_v40, 1 }
 0x1bf   :  { %v1231_v15 = vadd.f32 %v1230_v14, %v1229_v34  ;;  %v1293_v62 = vrot.slane %v1292_v61, 1 }
 0x1c0   :  { %v1273_v63 = vadd.f32 %v1272_v50, %v1271_v35  ;;  %v1252_v16 = vadd.f32 %v1251_v42, %v1250_v40 }
 0x1c1   :  { %v1625_v17 = vmul.f32 -1.442695, %v1231_v15  ;;  %v1294_v51 = vadd.f32 %v1293_v62, %v1292_v61 }
 0x1c2   :  { %v1627_v39 = vmul.f32 -1.442695, %v1273_v63  ;;  %v1626_v52 = vmul.f32 -1.442695, %v1252_v16 }
 0x1c3   :  { %1766 = vpow2.f32 %v1625_v17  ;;  %v1628_v18 = vmul.f32 -1.442695, %v1294_v51 }
 0x1c4   :  { %1768 = vpow2.f32 %v1627_v39 }
 0x1c5   :  { %1770 = vpow2.f32 %v1626_v52 }
 0x1c6   :  { %1772 = vpow2.f32 %v1628_v18 }
 0x1cd   :  { %v1767_v1 = vpop.eup %1766 }
 0x1ce   :  { %v1769_v45 = vpop.eup %1768  ;;  %v1307_v53 = vadd.f32 1.0, %v1767_v1 }
 0x1cf   :  { %v1771_v19 = vpop.eup %1770  ;;  %v1309_v38 = vadd.f32 1.0, %v1769_v45 }
 0x1d0   :  { %v1773_v3 = vpop.eup %1772  ;;  %1774 = vrcp.f32 %v1307_v53  ;;  %v1308_v20 = vadd.f32 1.0, %v1771_v19 }
 0x1d1   :  { %1776 = vrcp.f32 %v1309_v38  ;;  %v1310_v21 = vadd.f32 1.0, %v1773_v3 }
 0x1d2   :  { %1778 = vrcp.f32 %v1308_v20 }
 0x1d3   :  { %1780 = vrcp.f32 %v1310_v21 }
 0x1da   :  { %v1775_v22 = vpop.eup %1774 }
 0x1db   :  { %v1777_v5 = vpop.eup %1776 }
 0x1dc   :  { %v1779_v23 = vpop.eup %1778 }
 0x1dd   :  { %v1781_v47 = vpop.eup %1780  ;;  %v1323_v6 = vcombine.low %v1775_v22, %v1779_v23 }
 0x1de   :  { %v1324_v24 = vcombine.low %v1777_v5, %v1781_v47 }
 0x1df   :  { %v1331_v25 = vrot.slane %v1323_v6, %v1330_v41 }
 0x1e0   :  { %v1338_v56 = vrot.slane %v1324_v24, %v1330_v41 }
 0x1e2   :  { %v1339_v0 = vcombine.low %v1331_v25, %v1338_v56 }
 0x1e4   :  { %v1346_v26 = vrot.slane %v1339_v0, %v1330_v41 }
 0x1e6   :  { %1352 = vst.msk [vmem:[#allocation8] sm:$0xf] %vm1350_vm0, %v1346_v26 }
 0x1e7   :  { %1859 = shalt.err (!%p1856_p0)
}
 0x1e8   :  { %s1860_s25 = scalar_lea.hbm %s2774_s3, 64 }
 0x1e9   :  { %p1861_p1 = scmp.ne.s32.totalorder %s2774_s3, %s1860_s25  ;;  %p1864_p2 = scmp.lt.u32.totalorder %s1860_s25, %s2774_s3 }
 0x1eb   :  { %p1866_p3 = pnand %p1864_p2, %p1861_p1 }
 0x1ed   :  { %1869 = shalt.err (!%p1866_p3)
}
 0x1ee   :  { %1362 = dma.vmem_to_hbm [thread:$0]  %s1360_s21, 64, %s2774_s3, [#allocation4]  }
 0x1ef   :  { %1874 = dma.done.wait [#allocation4], 64  }
 0x1f0   :  { %1875 = vsyncadd [#allocation4], 4294967232 }
 0x1f1   :  { %1366 = vsyncpa [#allocation3], 1 }
 0x1f2   :  { %1367 = vsyncpa [#allocation6], 1 }
 0x1f3   :  { %1368 = vsyncpa [#allocation4], 1 }

</bundles_post_ra>
